<compile_context>
chip_gen: v7x
topology: tpu7x:2x2x1
jax: 0.10.0
libtpu: 0.0.40
codegen_flags: <defaults>
</compile_context>

<pallas_src>
import functools

import jax
import jax.numpy as jnp
from jax import lax
from jax.experimental import pallas as pl
from jax.experimental.pallas import tpu as pltpu

MASK_VALUE = -1e30  # large finite negative, avoids NaN for fully-masked rows


# -----------------------------------------------------------------------------
# Kernel 1: attention map over the per-source aggregated metadata vectors.
#   metadata: (bs, S, Dm), w: (Dm, 2*inner)  ->  softmax(qm km^T * inner^-0.5)
# One grid step, one (bs*S, Dm) x (Dm, 2*inner) matmul + one batched einsum.
# -----------------------------------------------------------------------------
def _meta_attn_kernel(meta_ref, w_ref, out_ref, *, inner_dim):
    bs, S, Dm = meta_ref.shape
    scale = float(inner_dim) ** -0.5
    qk = jnp.dot(meta_ref[...].reshape(bs * S, Dm), w_ref[...],
                 preferred_element_type=jnp.float32).reshape(bs, S, 2 * inner_dim)
    qm = qk[..., :inner_dim]
    km = qk[..., inner_dim:]
    dots = jnp.einsum("bqd,bkd->bqk", qm, km,
                      preferred_element_type=jnp.float32) * scale
    mx = jnp.max(dots, axis=-1, keepdims=True)
    e = jnp.exp(dots - mx)
    out_ref[...] = e / jnp.sum(e, axis=-1, keepdims=True)


def meta_attention_map(metadata, w_meta_qk, inner_dim):
    bs, S, Dm = metadata.shape
    kernel = functools.partial(_meta_attn_kernel, inner_dim=inner_dim)
    return pl.pallas_call(
        kernel,
        out_shape=jax.ShapeDtypeStruct((bs, S, S), jnp.float32),
        grid=(1,),
        in_specs=[
            pl.BlockSpec((bs, S, Dm), lambda i: (0, 0, 0)),
            pl.BlockSpec((Dm, 2 * inner_dim), lambda i: (0, 0)),
        ],
        out_specs=pl.BlockSpec((bs, S, S), lambda i: (0, 0, 0)),
    )(metadata, w_meta_qk)


# -----------------------------------------------------------------------------
# Host-side weight packing for the fused windowed attention kernel.
# Column layout of the packed projection (per head h, head-major):
#   [ qp_h | qc_h ]_h   [ kp_h | kc_h ]_h   [ v ]
# Rows are [values rows (Dv) ; metadata rows (Dm)], matching the host-side
# concat([values, metadata], -1), so the per-step projection is ONE dot.
# -----------------------------------------------------------------------------
def _pack_projection_weights(w_qkv, w_coords_qk, inner_dim, num_heads):
    Dv = w_qkv.shape[0]
    Dm = w_coords_qk.shape[0]
    H = num_heads
    dh = inner_dim // H

    def heads(w):                                   # (D, inner) -> (D, H, dh)
        return w.reshape(w.shape[0], H, dh)

    zv = jnp.zeros((Dv, H, dh), w_qkv.dtype)
    zm = jnp.zeros((Dm, H, dh), w_coords_qk.dtype)
    q_v = jnp.concatenate([heads(w_qkv[:, :inner_dim]), zv], axis=-1)
    k_v = jnp.concatenate([heads(w_qkv[:, inner_dim:2 * inner_dim]), zv], axis=-1)
    q_m = jnp.concatenate([zm, heads(w_coords_qk[:, :inner_dim])], axis=-1)
    k_m = jnp.concatenate([zm, heads(w_coords_qk[:, inner_dim:])], axis=-1)

    w_vals = jnp.concatenate(
        [q_v.reshape(Dv, 2 * inner_dim), k_v.reshape(Dv, 2 * inner_dim),
         w_qkv[:, 2 * inner_dim:]], axis=-1)                       # (Dv, 5*inner)
    w_meta = jnp.concatenate(
        [q_m.reshape(Dm, 2 * inner_dim), k_m.reshape(Dm, 2 * inner_dim),
         jnp.zeros((Dm, inner_dim), w_coords_qk.dtype)], axis=-1)  # (Dm, 5*inner)
    return jnp.concatenate([w_vals, w_meta], axis=0)               # (Dv+Dm, 5*inner)


# -----------------------------------------------------------------------------
# Kernel 2: fused windowed ValuesCoordinatesAttentionInternal.
# Grid = (bs,).  One step:
#   1. ONE packed projection of all S*N tokens of batch element b -> VMEM scratch.
#   2. For each query source s: gather its ws window sources (SMEM-prefetched
#      indices, in-VMEM dynamic index), head-batched online softmax with state
#      in registers.
#   3. ONE output projection for all S*N rows, single block write.
# -----------------------------------------------------------------------------
def _windowed_attn_kernel(idx_ref,                      # SMEM scalar prefetch (bs, S, ws)
                          x_ref, bias_ref, wpack_ref, wout_ref, bout_ref,
                          out_ref, proj_sc, *, num_heads, inner_dim):
    b = pl.program_id(0)
    S, N, Dc = x_ref.shape
    ws = idx_ref.shape[2]
    Dv = out_ref.shape[-1]
    H = num_heads
    dh = inner_dim // H
    i2 = 2 * inner_dim
    scale = float(dh) ** -0.5

    # --- Phase 1: one fused projection for every token of every source (M=S*N).
    x_all = x_ref[...].reshape(S * N, Dc)                                # bf16
    proj = jnp.dot(x_all, wpack_ref[...], preferred_element_type=jnp.float32)
    proj_sc[...] = proj.reshape(S, N, 5 * inner_dim).astype(jnp.bfloat16)

    def head_batch(mat, off, width):
        # (N, H*width) lane slices stacked into a head-batched (H, N, width) operand.
        return jnp.stack([mat[:, off + width * h: off + width * (h + 1)]
                          for h in range(H)], axis=0)

    # --- Phase 2: per query source, online softmax over the ws window sources.
    outs = []
    for s in range(S):
        self_idx = idx_ref[b, s, 0]      # slot 0 == self (diag-boosted top-1) == kept rows
        q_h = head_batch(proj_sc[self_idx], 0, 2 * dh)          # (H, N, 2dh) bf16

        m = jnp.full((H, N, 1), MASK_VALUE, jnp.float32)
        l = jnp.zeros((H, N, 1), jnp.float32)
        acc = jnp.zeros((H, N, dh), jnp.float32)

        for w in range(ws):
            src = idx_ref[b, s, w]
            chunk = proj_sc[src]                                # (N, 5*inner) bf16
            k_h = head_batch(chunk, i2, 2 * dh)                 # (H, N, 2dh)
            v_h = head_batch(chunk, 2 * i2, dh)                 # (H, N, dh)
            bias = bias_ref[src].reshape(1, 1, N)               # (1, 1, N) f32

            # fused positional + coordinate scores (contraction 2*dh), all heads
            dots = jnp.einsum("hqd,hkd->hqk", q_h, k_h,
                              preferred_element_type=jnp.float32) * scale + bias
            m_new = jnp.maximum(m, jnp.max(dots, axis=-1, keepdims=True))
            alpha = jnp.exp(m - m_new)
            p = jnp.exp(dots - m_new)
            l = alpha * l + jnp.sum(p, axis=-1, keepdims=True)
            acc = alpha * acc + jnp.einsum("hqk,hkd->hqd", p.astype(jnp.bfloat16),
                                           v_h, preferred_element_type=jnp.float32)
            m = m_new

        o = acc * pl.reciprocal(l, approx=True)                 # (H, N, dh) f32, EUP divide
        # back to head-major rows (N, inner), the layout the output proj expects
        outs.append(jnp.concatenate([o[h] for h in range(H)], axis=-1))

    # --- Phase 3: one output projection (full inner_dim contraction) for all rows.
    o_all = jnp.concatenate(outs, axis=0).astype(jnp.bfloat16)  # (S*N, inner)
    y = jnp.dot(o_all, wout_ref[...], preferred_element_type=jnp.float32) + bout_ref[...]
    out_ref[...] = y.reshape(S, N, Dv)


def windowed_values_metadata_attention(top_idx, x_cat, mask_bias, params,
                                       num_heads, inner_dim):
    """top_idx: (bs, S, ws) int32; x_cat: (bs, S, N, Dv+Dm) bf16;
    mask_bias: (bs, S, 1, N) f32 additive key bias.  Returns (bs, S, N, Dv) f32."""
    bs, S, N, Dc = x_cat.shape
    Dv = params["w_out"].shape[-1]

    w_pack = _pack_projection_weights(
        params["w_qkv"], params["w_coords_qk"], inner_dim, num_heads
    ).astype(jnp.bfloat16)
    w_out = params["w_out"].astype(jnp.bfloat16)
    b_out = params["b_out"].astype(jnp.float32)

    kernel = functools.partial(_windowed_attn_kernel,
                               num_heads=num_heads, inner_dim=inner_dim)
    # NOTE: at scaled-up sizes (v7x: 64 MiB VMEM), set vmem_limit_bytes and use
    # pipeline_mode=pl.Buffered(1) on the constant-index weight specs.
    grid_spec = pltpu.PrefetchScalarGridSpec(
        num_scalar_prefetch=1,
        grid=(bs,),
        in_specs=[
            pl.BlockSpec((None, S, N, Dc), lambda b, idx: (b, 0, 0, 0)),
            pl.BlockSpec((None, S, 1, N), lambda b, idx: (b, 0, 0, 0)),
            pl.BlockSpec((Dc, 5 * inner_dim), lambda b, idx: (0, 0)),
            pl.BlockSpec((inner_dim, Dv), lambda b, idx: (0, 0)),
            pl.BlockSpec((1, Dv), lambda b, idx: (0, 0)),
        ],
        out_specs=pl.BlockSpec((None, S, N, Dv), lambda b, idx: (b, 0, 0, 0)),
        scratch_shapes=[pltpu.VMEM((S, N, 5 * inner_dim), jnp.bfloat16)],
    )
    return pl.pallas_call(
        kernel,
        out_shape=jax.ShapeDtypeStruct((bs, S, N, Dv), jnp.float32),
        grid_spec=grid_spec,
        compiler_params=pltpu.CompilerParams(
            dimension_semantics=("parallel",)),   # 2-TC megacore split on v7x
    )(top_idx, x_cat, mask_bias, w_pack, w_out, b_out)


# -----------------------------------------------------------------------------
# Full forward (glue in JAX, hot paths in the Pallas kernels above).
# -----------------------------------------------------------------------------
def adaptive_values_metadata_attention(inputs, params, attention_mask=None, *,
                                       num_heads, inner_dim, window_size):
    assert inner_dim % num_heads == 0
    source_names = list(inputs.keys())
    # Per-source metadata aggregation: mean over tokens -> (bs, S, Dm)
    metadata = jnp.stack(
        [inputs[s]["embedded_metadata"].mean(axis=1) for s in source_names], axis=1)
    bs, S, Dm = metadata.shape
    ws = min(window_size, S)

    # Meta attention map (Pallas kernel) + self-boost + top-k window selection.
    meta_attn = meta_attention_map(metadata, params["w_meta_qk"], inner_dim)
    meta_attn = meta_attn + 2.0 * jnp.eye(S, dtype=meta_attn.dtype)
    _, top_indices = lax.top_k(meta_attn, ws)                 # (bs, S, ws), sorted

    # Pad each source to max_tokens along the token dim and stack.
    max_tokens = max(inputs[s]["embedded_values"].shape[1] for s in source_names)
    vals_list, meta_list, mask_list = [], [], []
    for s in source_names:
        sv = inputs[s]["embedded_values"]                     # (bs, n, Dv)
        sm = inputs[s]["embedded_metadata"]                   # (bs, n, Dm)
        n = sv.shape[1]
        pad = max_tokens - n
        vals_list.append(jnp.pad(sv, ((0, 0), (0, pad), (0, 0))))
        meta_list.append(jnp.pad(sm, ((0, 0), (0, pad), (0, 0))))
        if attention_mask is None:
            # Faithful to the reference: default mask is all-False for real tokens.
            msk = jnp.zeros((sv.shape[0], n), dtype=bool)
        else:
            msk = attention_mask[s]
        mask_list.append(jnp.pad(msk, ((0, 0), (0, pad)), constant_values=True))
    values = jnp.stack(vals_list, axis=1)                     # (bs, S, N, Dv)
    metas = jnp.stack(meta_list, axis=1)                      # (bs, S, N, Dm)
    masks = jnp.stack(mask_list, axis=1)                      # (bs, S, N) bool

    # Single concatenated bf16 input + precomputed f32 additive mask bias.
    x_cat = jnp.concatenate([values, metas], axis=-1).astype(jnp.bfloat16)
    mask_bias = jnp.where(masks, 0.0, MASK_VALUE).astype(jnp.float32)
    mask_bias = mask_bias.reshape(bs, S, 1, max_tokens)
    top_idx = top_indices.astype(jnp.int32)

    x = windowed_values_metadata_attention(top_idx, x_cat, mask_bias, params,
                                           num_heads, inner_dim)  # (bs,S,N,Dv)

    result = {}
    for i, s in enumerate(source_names):
        n = inputs[s]["embedded_values"].shape[1]
        result[s] = x[:, i, :n, :]
    return result


def init_params(key, values_dim, metadata_dim, inner_dim):
    ks = jax.random.split(key, 5)
    sc = 0.05
    return {
        # meta_to_qk: Linear(metadata_dim, inner_dim*2, bias=False)
        "w_meta_qk": sc * jax.random.normal(ks[0], (metadata_dim, 2 * inner_dim), jnp.float32),
        # values_to_qkv: Linear(values_dim, inner_dim*3, bias=False)
        "w_qkv": sc * jax.random.normal(ks[1], (values_dim, 3 * inner_dim), jnp.float32),
        # coords_to_qk: Linear(metadata_dim, inner_dim*2, bias=False)
        "w_coords_qk": sc * jax.random.normal(ks[2], (metadata_dim, 2 * inner_dim), jnp.float32),
        # output_proj: Linear(inner_dim, values_dim) (Dropout is identity at eval)
        "w_out": sc * jax.random.normal(ks[3], (inner_dim, values_dim), jnp.float32),
        "b_out": sc * jax.random.normal(ks[4], (1, values_dim), jnp.float32),
    }


if __name__ == "__main__":
    key = jax.random.PRNGKey(0)
    bs = 2
    values_dim, metadata_dim, inner_dim = 32, 16, 32
    num_heads, window_size = 4, 3
    source_tokens = {"sat": 8, "radar": 6, "station": 8, "buoy": 5}

    keys = jax.random.split(key, 2 * len(source_tokens) + 1)
    inputs = {}
    ki = 0
    for name, n in source_tokens.items():
        inputs[name] = {
            "embedded_values": jax.random.normal(keys[ki], (bs, n, values_dim), jnp.float32),
            "embedded_metadata": jax.random.normal(keys[ki + 1], (bs, n, metadata_dim), jnp.float32),
        }
        ki += 2
    # AttentionMap semantics: keys with mask == False are not attended to, so
    # pass True for valid tokens (padding gets True inside the forward, exactly
    # as in the reference).
    attention_mask = {name: jnp.ones((bs, n), dtype=bool)
                      for name, n in source_tokens.items()}

    params = init_params(keys[ki], values_dim, metadata_dim, inner_dim)

    out = adaptive_values_metadata_attention(
        inputs, params, attention_mask,
        num_heads=num_heads, inner_dim=inner_dim, window_size=window_size)
    out = jax.block_until_ready(out)

    for name, n in source_tokens.items():
        assert out[name].shape == (bs, n, values_dim), out[name].shape
        assert bool(jnp.all(jnp.isfinite(out[name])))
    print("KERNEL_OK")
</pallas_src>

<mosaic_0001>
module attributes {stable_mosaic.version = 11 : i64} {
  func.func @_meta_attn_kernel(%arg0: i32, %arg1: memref<2x4x16xf32, #tpu.memory_space<vmem>>, %arg2: memref<16x64xf32, #tpu.memory_space<vmem>>, %arg3: memref<2x4x4xf32, #tpu.memory_space<vmem>>) attributes {dimension_semantics = [#tpu.dimension_semantics<arbitrary>], iteration_bounds = array<i64: 1>, scalar_prefetch = 0 : i64, scratch_operands = 0 : i64, tpu.core_type = #tpu.core_type<tc>, window_params = [{pipeline_mode = #tpu.pipeline_mode<synchronous>, transform_indices = @transform_0, window_bounds = array<i64: 2, 4, 16>}, {pipeline_mode = #tpu.pipeline_mode<synchronous>, transform_indices = @transform_1, window_bounds = array<i64: 16, 64>}, {pipeline_mode = #tpu.pipeline_mode<synchronous>, transform_indices = @transform_2, window_bounds = array<i64: 2, 4, 4>}]} {
    %c0 = arith.constant 0 : index
    %c0_0 = arith.constant 0 : index
    %c0_1 = arith.constant 0 : index
    %0 = vector.load %arg1[%c0, %c0_0, %c0_1] : memref<2x4x16xf32, #tpu.memory_space<vmem>>, vector<2x4x16xf32>
    %1 = vector.shape_cast %0 : vector<2x4x16xf32> to vector<8x16xf32>
    %c0_2 = arith.constant 0 : index
    %c0_3 = arith.constant 0 : index
    %2 = vector.load %arg2[%c0_2, %c0_3] : memref<16x64xf32, #tpu.memory_space<vmem>>, vector<16x64xf32>
    %cst = arith.constant dense<0.000000e+00> : vector<8x64xf32>
    %3 = tpu.matmul %1, %2, %cst {dimension_numbers = #tpu.dot_dimension_numbers<[1], [0], [0], [1], [0, 0, 1, 1], [], []>} : vector<8x16xf32>, vector<16x64xf32>, vector<8x64xf32> -> vector<8x64xf32>
    %4 = vector.shape_cast %3 : vector<8x64xf32> to vector<2x4x64xf32>
    %5 = vector.extract_strided_slice %4 {offsets = [0, 0, 0], sizes = [2, 4, 32], strides = [1, 1, 1]} : vector<2x4x64xf32> to vector<2x4x32xf32>
    %6 = vector.extract_strided_slice %4 {offsets = [0, 0, 32], sizes = [2, 4, 32], strides = [1, 1, 1]} : vector<2x4x64xf32> to vector<2x4x32xf32>
    "tpu.trace_start"() <{level = 10 : i32, message = "bqd,bkd->bqk"}> : () -> ()
    %cst_4 = arith.constant dense<0.000000e+00> : vector<2x4x4xf32>
    %7 = tpu.matmul %5, %6, %cst_4 {dimension_numbers = #tpu.dot_dimension_numbers<[2], [2], [1], [1], [0, 0, 0, 1, 1, 1], [0], [0]>} : vector<2x4x32xf32>, vector<2x4x32xf32>, vector<2x4x4xf32> -> vector<2x4x4xf32>
    "tpu.trace_stop"() : () -> ()
    %cst_5 = arith.constant 0.176776692 : f32
    %8 = vector.broadcast %cst_5 : f32 to vector<2x4x4xf32>
    %9 = arith.mulf %7, %8 : vector<2x4x4xf32>
    %cst_6 = arith.constant dense<0xFF800000> : vector<2x4xf32>
    %10 = vector.multi_reduction <maximumf>, %9, %cst_6 [2] : vector<2x4x4xf32> to vector<2x4xf32>
    %11 = vector.shape_cast %10 : vector<2x4xf32> to vector<2x4x1xf32>
    %12 = vector.broadcast %11 : vector<2x4x1xf32> to vector<2x4x4xf32>
    %13 = arith.subf %9, %12 : vector<2x4x4xf32>
    %14 = math.exp %13 : vector<2x4x4xf32>
    %cst_7 = arith.constant dense<0.000000e+00> : vector<2x4xf32>
    %15 = vector.multi_reduction <add>, %14, %cst_7 [2] : vector<2x4x4xf32> to vector<2x4xf32>
    %16 = vector.shape_cast %15 : vector<2x4xf32> to vector<2x4x1xf32>
    %17 = vector.broadcast %16 : vector<2x4x1xf32> to vector<2x4x4xf32>
    %18 = arith.divf %14, %17 : vector<2x4x4xf32>
    %c0_8 = arith.constant 0 : index
    %c0_9 = arith.constant 0 : index
    %c0_10 = arith.constant 0 : index
    %19 = vector.load %arg3[%c0_8, %c0_9, %c0_10] : memref<2x4x4xf32, #tpu.memory_space<vmem>>, vector<2x4x4xf32>
    tpu.vector_store %arg3[%c0_8, %c0_9, %c0_10], %18 {strides = array<i32>} : memref<2x4x4xf32, #tpu.memory_space<vmem>>, vector<2x4x4xf32>,
    return
  }
  func.func @transform_0(%arg0: i32) -> (i32, i32, i32) {
    %c0_i32 = arith.constant 0 : i32
    %c0_i32_0 = arith.constant 0 : i32
    %c0_i32_1 = arith.constant 0 : i32
    %c0_i32_2 = arith.constant 0 : i32
    return %c0_i32, %c0_i32_0, %c0_i32_1 : i32, i32, i32
  }
  func.func @transform_1(%arg0: i32) -> (i32, i32) {
    %c0_i32 = arith.constant 0 : i32
    %c0_i32_0 = arith.constant 0 : i32
    %c0_i32_1 = arith.constant 0 : i32
    return %c0_i32, %c0_i32_0 : i32, i32
  }
  func.func @transform_2(%arg0: i32) -> (i32, i32, i32) {
    %c0_i32 = arith.constant 0 : i32
    %c0_i32_0 = arith.constant 0 : i32
    %c0_i32_1 = arith.constant 0 : i32
    %c0_i32_2 = arith.constant 0 : i32
    return %c0_i32, %c0_i32_0, %c0_i32_1 : i32, i32, i32
  }
}

</mosaic_0001>

<bundles_post_ra>
// kernel: tpu_custom_call.1
= control target key start
LH: loop header
LB: loop body
LE: loop exit
PB: predicated region body
PF: predicated region fallthrough
CT: control target
= control target key end

     0   :  { %7 = vsyncpa [#allocation3], 0  ;;  %s518_s0 = inlined_call_operand.hbm [shape: f32[2,4,16], index: 0, kind: input, shape index: {}]   ;;  %s519_s1 = inlined_call_operand.hbm [shape: f32[16,64], index: 1, kind: input, shape index: {}]   ;;  %s520_s2 = inlined_call_operand.hbm [shape: f32[2,4,4], index: 2, kind: output, shape index: {}]  }
   0x1   :  { %8 = vsyncpa [#allocation6], 0 }
   0x2   :  { %9 = vsyncpa [#allocation4], 0  ;;  %s444_s9 = smov [#allocation2]   ;;  %s372_s13 = scalar_lea.hbm %s518_s0, 128 }
   0x3   :  { %s15_s10 = sshll.u32 %s444_s9, 4  ;;  %p373_p0 = scmp.ne.s32.totalorder %s518_s0, %s372_s13  ;;  %s16_s10 = int_to_ptr.vmem [resolvable:$true] %s15_s10 }
   0x4   :  { %p376_p1 = scmp.lt.u32.totalorder %s372_s13, %s518_s0 }
   0x6   :  { %p378_p2 = pnand %p376_p1, %p373_p0 }
   0x8   :  { %381 = shalt.err (!%p378_p2)
}
   0x9   :  { %s382_s18 = scalar_lea.vmem %s16_s10, 128  ;;  %p387_p4 = scmp.lt.s32.totalorder %s16_s10, %s16_s10 }
   0xa   :  { %p383_p3 = scmp.ne.s32.totalorder %s16_s10, %s382_s18  ;;  %p388_p5 = scmp.lt.s32.totalorder %s382_s18, %s382_s18 }
   0xc   :  { %p389_p6 = por %p388_p5, %p387_p4 }
   0xe   :  { %p390_p7 = pnand %p389_p6, %p383_p3 }
  0x10   :  { %393 = shalt.err (!%p390_p7)
}
  0x11   :  { %s445_s19 = smov 64   ;;  %s446_s20 = smov 4  }
  0x12   :  { %21 = dma.hbm_to_vmem [thread:$0]  %s518_s0, 128, %s16_s10, [#allocation3], %s445_s19, %s445_s19, %s446_s20  }
  0x13   :  { %s447_s23 = smov [#allocation5]   ;;  %s394_s27 = scalar_lea.hbm %s519_s1, 256 }
  0x14   :  { %s27_s24 = sshll.u32 %s447_s23, 4  ;;  %p395_p8 = scmp.ne.s32.totalorder %s519_s1, %s394_s27  ;;  %s28_s24 = int_to_ptr.vmem [resolvable:$true] %s27_s24 }
  0x15   :  { %p398_p9 = scmp.lt.u32.totalorder %s394_s27, %s519_s1 }
  0x17   :  { %p400_p10 = pnand %p398_p9, %p395_p8 }
  0x19   :  { %403 = shalt.err (!%p400_p10)
}
  0x1a   :  { %s404_s4 = scalar_lea.vmem %s28_s24, 256  ;;  %p409_p12 = scmp.lt.s32.totalorder %s28_s24, %s28_s24 }
  0x1b   :  { %p405_p11 = scmp.ne.s32.totalorder %s28_s24, %s404_s4  ;;  %p410_p13 = scmp.lt.s32.totalorder %s404_s4, %s404_s4 }
  0x1d   :  { %p411_p0 = por %p410_p13, %p409_p12 }
  0x1f   :  { %p412_p1 = pnand %p411_p0, %p405_p11 }
  0x21   :  { %415 = shalt.err (!%p412_p1)
}
  0x22   :  { %s448_s0 = smov 128   ;;  %s449_s5 = smov 8  }
  0x23   :  { %33 = dma.hbm_to_vmem [thread:$0]  %s519_s1, 256, %s28_s24, [#allocation6], %s448_s0, %s448_s0, %s449_s5  }
  0x24   :  { %438 = dma.done.wait [#allocation3], 128  }
  0x25   :  { %439 = vsyncadd [#allocation3], 4294967168 }
  0x26   :  { %440 = dma.done.wait [#allocation6], 256  }
  0x27   :  { %441 = vsyncadd [#allocation6], 4294967040  ;;  %v450_v0 = vmov 0.0|0.0   ;;  %vm451_vm0 = vmmov 0   ;;  %v452_v1 = vmov 0.0   ;;  %v42_v2 = vld [vmem:[#allocation5] sm:$0xff] }
  0x28   :  { %349 = vmatprep.subr.bf16.mxu0 %v450_v0  ;;  %336 = vmatprep.mubr.msk.f32.mxu0 %vm451_vm0, %v452_v1  ;;  %v43_v3 = vld [vmem:[#allocation5 + $0x8] sm:$0xff]  ;;  %v363_v5 = vld [vmem:[#allocation2] sm:$0xff]   ;;  %vm47_vm1 = vcmask 130048   ;;  %s453_s1 = smov 96   ;;  %vm124_vm2 = vcmask 261120   ;;  %vm277_vm3 = vcmask 27648  }
  0x29   :  { %339 = vmatprep.subr.mxu1 %v452_v1  ;;  %341 = vmatprep.mubr.msk.f32.mxu1 %vm451_vm0, %v452_v1  ;;  %v350_v4 = vpack.c.bf16 %v43_v3, %v42_v2  ;;  %s454_s8 = smov [#allocation7]  }
  0x2a   :  { %s307_s9 = sshll.u32 %s454_s8, 4  ;;  %s308_s9 = int_to_ptr.vmem [resolvable:$true] %s307_s9 }
  0x2b   :  { %351 = vmatpush3.bf16.msra.mxu0 %v350_v4  ;;  %s416_s10 = scalar_lea.vmem %s308_s9, 128  ;;  %p421_p3 = scmp.lt.s32.totalorder %s308_s9, %s308_s9 }
  0x2c   :  { %344 = vmatprep.subr.mxu0 %v452_v1  ;;  %p417_p2 = scmp.ne.s32.totalorder %s308_s9, %s416_s10  ;;  %p422_p4 = scmp.lt.s32.totalorder %s416_s10, %s416_s10 }
  0x2e   :  { %337 = vmatmul.mubr.msk.f32.vlgmr.msra.gmra.mrb[0].mxu0 %vm47_vm1, %v363_v5  ;;  %p423_p5 = por %p422_p4, %p421_p3 }
  0x2f   :  { %346 = vmatprep.mubr.msk.f32.mxu0 %vm451_vm0, %v452_v1 }
  0x30   :  { %p424_p6 = pnand %p423_p5, %p417_p2 }
 0x101   :  { %v116_v6 = vpop.f32.mrb[0].mxu0 }
 0x102   :  { %122 = vrot.lane.b32.xlu0 %v116_v6, %s453_s1  ;;  %v338_v7 = vpop.f32.mrb[1].mxu0  ;;  %v121_v8 = vcombine.high %v116_v6, %v116_v6 }
 0x106   :  { %199 = vrot.lane.b32.xlu0 %v121_v8, %s453_s1 }
 0x174   :  { %v123_v9 = vpop.permute.xlu0 %122 }
 0x175   :  { %340 = vmatpush3.xpose.msk.msra.mxu1 %vm124_vm2, %v123_v9 }
 0x178   :  { %342 = vmatmul.mubr.msk.f32.vlgmr.msra.gmra.mrb[0].mxu1 %vm124_vm2, %v116_v6  ;;  %v200_v10 = vpop.permute.xlu0 %199 }
 0x179   :  { %345 = vmatpush3.xpose.msk.msra.mxu0 %vm124_vm2, %v200_v10 }
 0x17c   :  { %347 = vmatmul.mubr.msk.f32.vlgmr.msra.gmra.mrb[2].mxu0 %vm124_vm2, %v121_v8 }
 0x24b   :  { %v195_v11 = vpop.f32.mrb[0].mxu1 }
 0x24c   :  { %v275_v12 = vmul.f32 0.17677669, %v195_v11  ;;  %v343_v13 = vpop.f32.mrb[1].mxu1 }
 0x24e   :  { %v278_v14 = vsel %vm277_vm3, %v275_v12, -inf }
 0x24f   :  { %279 = vmax.xlane.f32.xlu1 %v278_v14  ;;  %v271_v15 = vpop.f32.mrb[2].mxu0 }
 0x250   :  { %v276_v16 = vmul.f32 0.17677669, %v271_v15  ;;  %v348_v17 = vpop.f32.mrb[3].mxu0 }
 0x252   :  { %v281_v18 = vsel %vm277_vm3, %v276_v16, -inf }
 0x253   :  { %282 = vmax.xlane.f32.xlu1 %v281_v18 }
 0x2dc   :  { %v280_v19 = vpop.xlane.xlu1 %279 }
 0x2dd   :  { %v284_v20 = vsub.f32 %v275_v12, %v280_v19 }
 0x2df   :  { %v286_v21 = vmul.f32 1.442695, %v284_v20 }
 0x2e0   :  { %v283_v22 = vpop.xlane.xlu1 %282 }
 0x2e1   :  { %364 = vpow2.f32 %v286_v21  ;;  %v285_v23 = vsub.f32 %v276_v16, %v283_v22 }
 0x2e3   :  { %v288_v24 = vmul.f32 1.442695, %v285_v23 }
 0x2e5   :  { %366 = vpow2.f32 %v288_v24 }
 0x2eb   :  { %v365_v25 = vpop.eup %364 }
 0x2ec   :  { %v290_v26 = vsel %vm277_vm3, %v365_v25, 0.0 }
 0x2ed   :  { %291 = vadd.xlane.f32.xlu0 %v290_v26 }
 0x2ef   :  { %v367_v27 = vpop.eup %366 }
 0x2f0   :  { %v293_v28 = vsel %vm277_vm3, %v367_v27, 0.0 }
 0x2f1   :  { %294 = vadd.xlane.f32.xlu1 %v293_v28 }
 0x37a   :  { %v292_v29 = vpop.xlane.xlu0 %291 }
 0x37b   :  { %368 = vrcp.f32 %v292_v29 }
 0x37e   :  { %v295_v30 = vpop.xlane.xlu1 %294 }
 0x37f   :  { %370 = vrcp.f32 %v295_v30 }
 0x385   :  { %v369_v31 = vpop.eup %368 }
 0x386   :  { %v297_v32 = vmul.f32 %v369_v31, %v365_v25 }
 0x388   :  { %300 = vst.msk [vmem:[#allocation7] sm:$0xf] %vm277_vm3, %v297_v32 }
 0x389   :  { %v371_v33 = vpop.eup %370 }
 0x38a   :  { %v299_v34 = vmul.f32 %v371_v33, %v367_v27 }
 0x38c   :  { %301 = vst.msk [vmem:[#allocation7 + $0x4] sm:$0xf] %vm277_vm3, %v299_v34 }
 0x38d   :  { %427 = shalt.err (!%p424_p6)
}
 0x38e   :  { %s428_s13 = scalar_lea.hbm %s520_s2, 128 }
 0x38f   :  { %p429_p7 = scmp.ne.s32.totalorder %s520_s2, %s428_s13  ;;  %p432_p8 = scmp.lt.u32.totalorder %s428_s13, %s520_s2 }
 0x391   :  { %p434_p9 = pnand %p432_p8, %p429_p7 }
 0x393   :  { %437 = shalt.err (!%p434_p9)
}
 0x394   :  { %313 = dma.vmem_to_hbm [thread:$0]  %s308_s9, 128, %s520_s2, [#allocation4], %s445_s19, %s445_s19, %s446_s20  }
 0x395   :  { %442 = dma.done.wait [#allocation4], 128  }
 0x396   :  { %443 = vsyncadd [#allocation4], 4294967168 }
 0x397   :  { %317 = vsyncpa [#allocation3], 1 }
 0x398   :  { %318 = vsyncpa [#allocation6], 1 }
 0x399   :  { %319 = vsyncpa [#allocation4], 1 }

</bundles_post_ra>
